<compile_context>
chip_gen: v7x
topology: tpu7x:2x2x1
jax: 0.10.0
libtpu: 0.0.40
codegen_flags: <defaults>
</compile_context>

<pallas_src>
import functools

import jax
import jax.numpy as jnp
from jax.experimental import pallas as pl
from jax.experimental.pallas import tpu as pltpu

HIDDEN = 80
HIDDEN_PAD = 128   # pad hidden to the lane width -> unmasked layouts, full MXU N
OUT = 1


def _round_up(n, m):
    return ((n + m - 1) // m) * m


def adultnet_kernel(x_ref, w1_ref, b1_ref, w2_ref, b2_ref, o_ref):
    # fc1: MXU matmul with f32 accumulation; bias + ReLU in f32 on the VPU.
    h = jnp.dot(x_ref[...], w1_ref[...], preferred_element_type=jnp.float32)
    h = jnp.maximum(h + b1_ref[...], 0.0)                      # (TB, 128) f32, lane-dense

    # fc2: contract the padded hidden dim of both operands -> (1, TB).
    # Batch lands on lanes, so the store below is a lane-dense, unmasked write.
    z = jnp.einsum("oh,bh->ob", w2_ref[...], h,
                   preferred_element_type=jnp.float32)         # (1, TB) f32
    z = z + b2_ref[0]                                          # scalar bias from SMEM
    o_ref[...] = jax.nn.sigmoid(z).astype(o_ref.dtype)         # exp + recip on the EUP


@functools.partial(jax.jit, static_argnames=("bf16_inputs",))
def adultnet_forward(x, w1, b1, w2, b2, *, bf16_inputs=False):
    """AdultNet forward.

    x : (B, F) float32
    w1: (F, 80)   b1: (80,) or (1, 80)     (torch weight stored transposed: x @ W1)
    w2: (80, 1)   b2: scalar-shaped ((1,1), (1,) or ())
    Returns (ans, ans) with ans of shape (B,) float32 — matches torch .flatten().
    """
    B, F = x.shape

    # Batch tiling: bigger lane-friendly tiles at larger batches (fewer grid steps),
    # small tile at small batches (less tail padding).
    if B >= 4096:
        TB = 1024
    elif B >= 512:
        TB = 512
    else:
        TB = 128
    Bp = _round_up(B, TB)
    grid = (Bp // TB,)

    # Pad batch (tail tile) and hidden (80 -> 128).
    xp = x if Bp == B else jnp.pad(x, ((0, Bp - B), (0, 0)))
    w1p = jnp.pad(w1, ((0, 0), (0, HIDDEN_PAD - HIDDEN)))
    b1p = jnp.pad(jnp.reshape(b1, (1, HIDDEN)),
                  ((0, 0), (0, HIDDEN_PAD - HIDDEN))).astype(jnp.float32)
    w2p = jnp.pad(jnp.reshape(w2, (1, HIDDEN)),
                  ((0, 0), (0, HIDDEN_PAD - HIDDEN))).astype(jnp.float32)
    b2p = jnp.reshape(b2, (1,)).astype(jnp.float32)

    if bf16_inputs:
        # Halve HBM traffic on the dominant tensors; accumulation stays f32 in-kernel.
        xp = xp.astype(jnp.bfloat16)
        w1p = w1p.astype(jnp.bfloat16)

    out = pl.pallas_call(
        adultnet_kernel,
        out_shape=jax.ShapeDtypeStruct((1, Bp), jnp.float32),
        grid=grid,
        in_specs=[
            pl.BlockSpec((TB, F), lambda i: (i, 0)),              # x: streamed per batch tile
            pl.BlockSpec((F, HIDDEN_PAD), lambda i: (0, 0)),      # w1: resident in VMEM
            pl.BlockSpec((1, HIDDEN_PAD), lambda i: (0, 0)),      # b1: resident
            pl.BlockSpec((1, HIDDEN_PAD), lambda i: (0, 0)),      # w2 row: resident
            pl.BlockSpec(memory_space=pltpu.MemorySpace.SMEM),    # b2: scalar in SMEM
        ],
        out_specs=pl.BlockSpec((1, TB), lambda i: (0, i)),        # lane-dense output slab
        compiler_params=pltpu.CompilerParams(
            dimension_semantics=("parallel",),                    # batch axis is independent
        ),
    )(xp, w1p, b1p, w2p, b2p)

    ans = out.reshape(-1)[:B]   # drop batch padding; (B,) like torch .flatten()
    return ans, ans


def init_params(in_features, key):
    """Deterministic init mimicking nn.Linear default (uniform +/- 1/sqrt(fan_in))."""
    k1, k2, k3, k4 = jax.random.split(key, 4)
    lim1 = 1.0 / jnp.sqrt(jnp.float32(in_features))
    lim2 = 1.0 / jnp.sqrt(jnp.float32(HIDDEN))
    # stored as (in, out) so the kernel computes x @ W (== torch x @ W.T)
    w1 = jax.random.uniform(k1, (in_features, HIDDEN), jnp.float32, -lim1, lim1)
    b1 = jax.random.uniform(k2, (1, HIDDEN), jnp.float32, -lim1, lim1)
    w2 = jax.random.uniform(k3, (HIDDEN, OUT), jnp.float32, -lim2, lim2)
    b2 = jax.random.uniform(k4, (1, OUT), jnp.float32, -lim2, lim2)
    return w1, b1, w2, b2


if __name__ == "__main__":
    key = jax.random.PRNGKey(0)
    kx, kp = jax.random.split(key)

    # Small shapes: B=300 exercises a multi-tile grid (TB=128, padded to 384, grid=(3,))
    # plus the batch-tail padding path; F=32 is a typical "adult" tabular feature width.
    B, F = 300, 32
    x = jax.random.normal(kx, (B, F), jnp.float32)
    w1, b1, w2, b2 = init_params(F, kp)

    # plain-JAX f32 reference
    h_ref = jnp.maximum(x @ w1 + b1, 0.0)
    ref = jax.nn.sigmoid(h_ref @ w2 + b2).reshape(-1)

    # exact (f32 storage) path
    a32, a32b = adultnet_forward(x, w1, b1, w2, b2, bf16_inputs=False)
    jax.block_until_ready((a32, a32b))
    assert a32.shape == (B,)
    assert jnp.allclose(a32, ref, atol=1e-4), "f32 kernel mismatch vs reference"
    assert jnp.array_equal(a32, a32b), "tuple outputs must match"

    # bf16-storage (HBM-bandwidth) path — expect small numeric drift
    a16, a16b = adultnet_forward(x, w1, b1, w2, b2, bf16_inputs=True)
    jax.block_until_ready((a16, a16b))
    assert a16.shape == (B,)
    assert jnp.allclose(a16, ref, atol=2e-2), "bf16 kernel mismatch vs reference"
    assert jnp.array_equal(a16, a16b), "tuple outputs must match"

    print("KERNEL_OK")
</pallas_src>

<mosaic_0001>
module attributes {stable_mosaic.version = 11 : i64} {
  func.func @adultnet_kernel(%arg0: i32, %arg1: memref<128x32xf32, #tpu.memory_space<vmem>>, %arg2: memref<32x128xf32, #tpu.memory_space<vmem>>, %arg3: memref<1x128xf32, #tpu.memory_space<vmem>>, %arg4: memref<1x128xf32, #tpu.memory_space<vmem>>, %arg5: memref<1xf32, #tpu.memory_space<smem>>, %arg6: memref<1x128xf32, #tpu.memory_space<vmem>>) attributes {dimension_semantics = [#tpu.dimension_semantics<parallel>], iteration_bounds = array<i64: 3>, scalar_prefetch = 0 : i64, scratch_operands = 0 : i64, tpu.core_type = #tpu.core_type<tc>, window_params = [{transform_indices = @transform_0, window_bounds = array<i64: 128, 32>}, {pipeline_mode = #tpu.pipeline_mode<synchronous>, transform_indices = @transform_1, window_bounds = array<i64: 32, 128>}, {pipeline_mode = #tpu.pipeline_mode<synchronous>, transform_indices = @transform_2, window_bounds = array<i64: 1, 128>}, {pipeline_mode = #tpu.pipeline_mode<synchronous>, transform_indices = @transform_3, window_bounds = array<i64: 1, 128>}, {transform_indices = @transform_4, window_bounds = array<i64: 1>}, {transform_indices = @transform_5, window_bounds = array<i64: 1, 128>}]} {
    %c0 = arith.constant 0 : index
    %c0_0 = arith.constant 0 : index
    %0 = vector.load %arg1[%c0, %c0_0] : memref<128x32xf32, #tpu.memory_space<vmem>>, vector<128x32xf32>
    %c0_1 = arith.constant 0 : index
    %c0_2 = arith.constant 0 : index
    %1 = vector.load %arg2[%c0_1, %c0_2] : memref<32x128xf32, #tpu.memory_space<vmem>>, vector<32x128xf32>
    %cst = arith.constant dense<0.000000e+00> : vector<128x128xf32>
    %2 = tpu.matmul %0, %1, %cst {dimension_numbers = #tpu.dot_dimension_numbers<[1], [0], [0], [1], [0, 0, 1, 1], [], []>} : vector<128x32xf32>, vector<32x128xf32>, vector<128x128xf32> -> vector<128x128xf32>
    %c0_3 = arith.constant 0 : index
    %c0_4 = arith.constant 0 : index
    %3 = vector.load %arg3[%c0_3, %c0_4] : memref<1x128xf32, #tpu.memory_space<vmem>>, vector<1x128xf32>
    %4 = vector.broadcast %3 : vector<1x128xf32> to vector<128x128xf32>
    %5 = arith.addf %2, %4 : vector<128x128xf32>
    %cst_5 = arith.constant 0.000000e+00 : f32
    %6 = vector.broadcast %cst_5 : f32 to vector<128x128xf32>
    %7 = arith.maximumf %5, %6 : vector<128x128xf32>
    %c0_6 = arith.constant 0 : index
    %c0_7 = arith.constant 0 : index
    %8 = vector.load %arg4[%c0_6, %c0_7] : memref<1x128xf32, #tpu.memory_space<vmem>>, vector<1x128xf32>
    "tpu.trace_start"() <{level = 10 : i32, message = "oh,bh->ob"}> : () -> ()
    %cst_8 = arith.constant dense<0.000000e+00> : vector<1x128xf32>
    %9 = tpu.matmul %8, %7, %cst_8 {dimension_numbers = #tpu.dot_dimension_numbers<[1], [1], [0], [0], [0, 0, 1, 0], [], []>} : vector<1x128xf32>, vector<128x128xf32>, vector<1x128xf32> -> vector<1x128xf32>
    "tpu.trace_stop"() : () -> ()
    %c0_9 = arith.constant 0 : index
    %10 = memref.load %arg5[%c0_9] : memref<1xf32, #tpu.memory_space<smem>>
    %11 = vector.broadcast %10 : f32 to vector<1x128xf32>
    %12 = arith.addf %9, %11 : vector<1x128xf32>
    %13 = arith.negf %12 : vector<1x128xf32>
    %14 = math.exp %13 : vector<1x128xf32>
    %cst_10 = arith.constant 1.000000e+00 : f32
    %15 = vector.broadcast %cst_10 : f32 to vector<1x128xf32>
    %16 = arith.addf %15, %14 : vector<1x128xf32>
    %17 = arith.divf %15, %16 : vector<1x128xf32>
    %c0_11 = arith.constant 0 : index
    %c0_12 = arith.constant 0 : index
    %18 = vector.load %arg6[%c0_11, %c0_12] : memref<1x128xf32, #tpu.memory_space<vmem>>, vector<1x128xf32>
    tpu.vector_store %arg6[%c0_11, %c0_12], %17 {strides = array<i32>} : memref<1x128xf32, #tpu.memory_space<vmem>>, vector<1x128xf32>,
    return
  }
  func.func @transform_0(%arg0: i32) -> (i32, i32) {
    %c0_i32 = arith.constant 0 : i32
    %c0_i32_0 = arith.constant 0 : i32
    return %arg0, %c0_i32 : i32, i32
  }
  func.func @transform_1(%arg0: i32) -> (i32, i32) {
    %c0_i32 = arith.constant 0 : i32
    %c0_i32_0 = arith.constant 0 : i32
    %c0_i32_1 = arith.constant 0 : i32
    return %c0_i32, %c0_i32_0 : i32, i32
  }
  func.func @transform_2(%arg0: i32) -> (i32, i32) {
    %c0_i32 = arith.constant 0 : i32
    %c0_i32_0 = arith.constant 0 : i32
    %c0_i32_1 = arith.constant 0 : i32
    return %c0_i32, %c0_i32_0 : i32, i32
  }
  func.func @transform_3(%arg0: i32) -> (i32, i32) {
    %c0_i32 = arith.constant 0 : i32
    %c0_i32_0 = arith.constant 0 : i32
    %c0_i32_1 = arith.constant 0 : i32
    return %c0_i32, %c0_i32_0 : i32, i32
  }
  func.func @transform_4(%arg0: i32) -> i32 {
    %c0_i32 = arith.constant 0 : i32
    %c0_i32_0 = arith.constant 0 : i32
    return %c0_i32 : i32
  }
  func.func @transform_5(%arg0: i32) -> (i32, i32) {
    %c0_i32 = arith.constant 0 : i32
    %c0_i32_0 = arith.constant 0 : i32
    return %c0_i32, %arg0 : i32, i32
  }
}

</mosaic_0001>

<bundles_post_ra>
// kernel: adultnet_forward.1
= control target key start
LH: loop header
LB: loop body
LE: loop exit
PB: predicated region body
PF: predicated region fallthrough
CT: control target
= control target key end

     0   :  { %s810_s20 = smov 0   ;;  %s892_s0 = inlined_call_operand.vmem [shape: f32[384,32], index: 0, kind: input, shape index: {}]   ;;  %s893_s1 = inlined_call_operand.vmem [shape: f32[32,128], index: 1, kind: input, shape index: {}]   ;;  %s894_s2 = inlined_call_operand.vmem [shape: f32[1,128], index: 2, kind: input, shape index: {}]   ;;  %s895_s3 = inlined_call_operand.vmem [shape: f32[1,128], index: 3, kind: input, shape index: {}]   ;;  %s896_s4 = inlined_call_operand.<no memory space> [shape: f32[1], index: 4, kind: input, shape index: {}]   ;;  %s897_s5 = inlined_call_operand.vmem [shape: f32[1,384], index: 5, kind: output, shape index: {}]  }
   0x1   :  { %10 = sst [smem:[#allocation2]] %s896_s4 }
   0x2 LB: > { %s816_s21 = sadd.s32 4294967295, %s772_s20   ;;  %p592_p0 = scmp.ge.s32.totalorder %s772_s20, 1  ;;  %s772_s20 = sphi %s810_s20, %s16_s20  }
   0x3   : > { %p189_p1 = scmp.lt.s32.totalorder %s772_s20, 4 }
   0x5   : > { %p190_p2 = pnand %p592_p0, %p189_p1 }
   0x6   : > { %v240_v0 = vld [vmem:[%s893_s1] sm:$0xff] (!%p190_p2)  ;;  %v241_v1 = vld [vmem:[%s893_s1 + $0x8] sm:$0xff] (!%p190_p2)  ;;  %v242_v2 = vld [vmem:[%s893_s1 + $0x10] sm:$0xff] (!%p190_p2)  ;;  %s593_s27 = sshll.u32 (!%p190_p2), %s816_s21, 4  ;;  %vm251_vm0 = vcmask (!%p190_p2), 261120   ;;  %v774_v22 = vmov (!%p190_p2), 0.0|0.0  }
   0x7   : > { %193 = sbr.rel (%p190_p2) target bundleno = 542 (0x21e), region = 40  ;;  %v719_v3 = vpack.c.bf16 (!%p190_p2), %v241_v1, %v240_v0  ;;  %v243_v4 = vld [vmem:[%s893_s1 + $0x18] sm:$0xff] (!%p190_p2)  ;;  %p216_p3 = scmp.lt.s32.totalorder (!%p190_p2), %s593_s27, 47  ;;  %727 = vmatprep.subr.bf16.mxu1 (!%p190_p2), %v774_v22  ;;  %vm775_vm1 = vmmov (!%p190_p2), 0   ;;  %v776_v23 = vmov (!%p190_p2), 0.0  }
   0x8   : > { %v723_v5 = vpack.c.bf16 (!%p190_p2), %v243_v4, %v242_v2  ;;  %716 = vmatprep.mubr.msk.f32.mxu1 (!%p190_p2), %vm775_vm1, %v776_v23  ;;  %v595_v24 = vld [vmem:[%s894_s2] ss:$0 sm:$0xff] (!%p190_p2)  ;;  %s462_s13 = sld [smem:[#allocation2]] (!%p190_p2)  ;;  %p221_p4 = scmp.lt.s32.totalorder (!%p190_p2), %s816_s21, 2 }
   0x9   : > { %720 = vmatprep.subr.bf16.mxu0 (!%p190_p2), %v719_v3 }
   0xa   : > { %722 = vmatpush3.bf16.msra.mxu0 (!%p190_p2), %v719_v3 }
   0xb   : > { %724 = vmatprep.subr.bf16.mxu0 (!%p190_p2), %v723_v5 }
   0xe   : > { %s899_s27 = smov (!%p216_p3, %s593_s27), 47  ;;  %726 = vmatpush3.bf16.msra.mxu0 %v723_v5  ;;  %s901_s21 = smov (!%p221_p4, %s816_s21), 2 }
   0xf   : > { %s594_s30 = sshll.u32 %s899_s27, 3  ;;  %s223_s16 = scalar_lea.vmem %s897_s5, %s901_s21 }
  0x10   : > { %s836_s8 = scalar_lea.vmem %s892_s0, %s594_s30 }
  0x11   : > { %v224_v6 = vld [vmem:[%s836_s8] sm:$0xff]  ;;  %v225_v7 = vld [vmem:[%s836_s8 + $0x8] sm:$0xff]  ;;  %v226_v8 = vld [vmem:[%s836_s8 + $0x10] sm:$0xff] }
  0x12   : > { %660 = vmatprep.mubr.msk.f32.mxu0 %vm251_vm0, %v224_v6  ;;  %v227_v9 = vld [vmem:[%s836_s8 + $0x18] sm:$0xff]  ;;  %v228_v10 = vld [vmem:[%s836_s8 + $0x20] sm:$0xff]  ;;  %v229_v11 = vld [vmem:[%s836_s8 + $0x28] sm:$0xff] }
  0x13   : > { %661 = vmatmul.mubr.msk.f32.vlgmr.msra.gmra.mrb[0].mxu0 %vm251_vm0, %v225_v7  ;;  %v230_v12 = vld [vmem:[%s836_s8 + $0x30] sm:$0xff]  ;;  %v231_v13 = vld [vmem:[%s836_s8 + $0x38] sm:$0xff]  ;;  %v232_v14 = vld [vmem:[%s836_s8 + $0x40] sm:$0xff] }
  0x14   : > { %663 = vmatprep.mubr.msk.f32.mxu0 %vm251_vm0, %v226_v8  ;;  %v233_v15 = vld [vmem:[%s836_s8 + $0x48] sm:$0xff]  ;;  %v234_v16 = vld [vmem:[%s836_s8 + $0x50] sm:$0xff]  ;;  %v235_v17 = vld [vmem:[%s836_s8 + $0x58] sm:$0xff] }
  0x15   : > { %v236_v18 = vld [vmem:[%s836_s8 + $0x60] sm:$0xff]  ;;  %v237_v19 = vld [vmem:[%s836_s8 + $0x68] sm:$0xff]  ;;  %v238_v20 = vld [vmem:[%s836_s8 + $0x70] sm:$0xff] }
  0x16   : > { %v239_v21 = vld [vmem:[%s836_s8 + $0x78] sm:$0xff] }
  0x17   : > { %664 = vmatmul.mubr.msk.f32.gmra.mrb[2].mxu0 %vm251_vm0, %v227_v9 }
  0x18   : > { %666 = vmatprep.mubr.msk.f32.mxu0 %vm251_vm0, %v228_v10 }
  0x1b   : > { %667 = vmatmul.mubr.msk.f32.gmra.mrb[4].mxu0 %vm251_vm0, %v229_v11 }
  0x1c   : > { %669 = vmatprep.mubr.msk.f32.mxu0 %vm251_vm0, %v230_v12 }
  0x1f   : > { %670 = vmatmul.mubr.msk.f32.gmra.mrb[6].mxu0 %vm251_vm0, %v231_v13 }
  0x20   : > { %672 = vmatprep.mubr.msk.f32.mxu0 %vm251_vm0, %v232_v14 }
  0x23   : > { %673 = vmatmul.mubr.msk.f32.gmra.mrb[8].mxu0 %vm251_vm0, %v233_v15 }
  0x24   : > { %675 = vmatprep.mubr.msk.f32.mxu0 %vm251_vm0, %v234_v16 }
  0x27   : > { %676 = vmatmul.mubr.msk.f32.gmra.mrb[10].mxu0 %vm251_vm0, %v235_v17  ;;  %v461_v17 = vld [vmem:[%s895_s3] sm:$0x1] }
  0x28   : > { %678 = vmatprep.mubr.msk.f32.mxu0 %vm251_vm0, %v236_v18  ;;  %v463_v18 = vstv %s462_s13 }
  0x2b   : > { %679 = vmatmul.mubr.msk.f32.gmra.mrb[12].mxu0 %vm251_vm0, %v237_v19 }
  0x2c   : > { %681 = vmatprep.mubr.msk.f32.mxu0 %vm251_vm0, %v238_v20 }
  0x2f   : > { %682 = vmatmul.mubr.msk.f32.gmra.mrb[14].mxu0 %vm251_vm0, %v239_v21 }
  0xe6   : > { %v662_v25 = vpop.f32.mrb[0].mxu0 }
  0xe7   : > { %v372_v26 = vadd.f32 %v662_v25, %v595_v24  ;;  %v366_v27 = vpop.f32.mrb[1].mxu0 }
  0xe8   : > { %v367_v28 = vadd.f32 %v595_v24, %v366_v27 }
  0xe9   : > { %v446_v29 = vmax.f32 %v372_v26, 0.0 }
  0xea   : > { %v445_v30 = vmax.f32 %v367_v28, 0.0  ;;  %v665_v31 = vpop.f32.mrb[2].mxu0 }
  0xeb   : > { %v382_v32 = vadd.f32 %v665_v31, %v595_v24  ;;  %v376_v33 = vpop.f32.mrb[3].mxu0 }
  0xec   : > { %v377_v34 = vadd.f32 %v595_v24, %v376_v33  ;;  %v728_v35 = vpack.c.bf16 %v446_v29, %v445_v30 }
  0xed   : > { %v448_v36 = vmax.f32 %v382_v32, 0.0 }
  0xee   : > { %v447_v37 = vmax.f32 %v377_v34, 0.0  ;;  %729 = vmatpush3.bf16.xpose.msra.mxu1 %v728_v35  ;;  %v668_v38 = vpop.f32.mrb[4].mxu0 }
  0xef   : > { %v392_v39 = vadd.f32 %v668_v38, %v595_v24  ;;  %730 = vmatprep.subr.bf16.mxu1 %v774_v22  ;;  %v386_v40 = vpop.f32.mrb[5].mxu0 }
  0xf0   : > { %v731_v41 = vpack.c.bf16 %v448_v36, %v447_v37  ;;  %v387_v42 = vadd.f32 %v595_v24, %v386_v40 }
  0xf1   : > { %v450_v43 = vmax.f32 %v392_v39, 0.0 }
  0xf2   : > { %v449_v44 = vmax.f32 %v387_v42, 0.0  ;;  %v671_v45 = vpop.f32.mrb[6].mxu0 }
  0xf3   : > { %v402_v46 = vadd.f32 %v671_v45, %v595_v24  ;;  %v396_v47 = vpop.f32.mrb[7].mxu0 }
  0xf4   : > { %v734_v48 = vpack.c.bf16 %v450_v43, %v449_v44  ;;  %v397_v49 = vadd.f32 %v595_v24, %v396_v47 }
  0xf5   : > { %v452_v50 = vmax.f32 %v402_v46, 0.0 }
  0xf6   : > { %732 = vmatpush3.bf16.xpose.msra.mxu1 %v731_v41  ;;  %v451_v51 = vmax.f32 %v397_v49, 0.0  ;;  %v674_v52 = vpop.f32.mrb[8].mxu0 }
  0xf7   : > { %733 = vmatprep.subr.bf16.mxu1 %v774_v22  ;;  %v412_v53 = vadd.f32 %v674_v52, %v595_v24  ;;  %v406_v54 = vpop.f32.mrb[9].mxu0 }
  0xf8   : > { %v737_v55 = vpack.c.bf16 %v452_v50, %v451_v51  ;;  %v407_v56 = vadd.f32 %v595_v24, %v406_v54 }
  0xf9   : > { %v454_v57 = vmax.f32 %v412_v53, 0.0 }
  0xfa   : > { %v453_v58 = vmax.f32 %v407_v56, 0.0  ;;  %v677_v59 = vpop.f32.mrb[10].mxu0 }
  0xfb   : > { %v422_v60 = vadd.f32 %v677_v59, %v595_v24  ;;  %v416_v61 = vpop.f32.mrb[11].mxu0 }
  0xfc   : > { %v740_v62 = vpack.c.bf16 %v454_v57, %v453_v58  ;;  %v417_v63 = vadd.f32 %v595_v24, %v416_v61 }
  0xfd   : > { %v456_v0 = vmax.f32 %v422_v60, 0.0 }
  0xfe   : > { %735 = vmatpush3.bf16.xpose.msra.mxu1 %v734_v48  ;;  %v455_v1 = vmax.f32 %v417_v63, 0.0  ;;  %v680_v2 = vpop.f32.mrb[12].mxu0 }
  0xff   : > { %736 = vmatprep.subr.bf16.mxu1 %v774_v22  ;;  %v432_v3 = vadd.f32 %v680_v2, %v595_v24  ;;  %v426_v4 = vpop.f32.mrb[13].mxu0 }
 0x100   : > { %v743_v5 = vpack.c.bf16 %v456_v0, %v455_v1  ;;  %v427_v6 = vadd.f32 %v595_v24, %v426_v4 }
 0x101   : > { %v458_v7 = vmax.f32 %v432_v3, 0.0 }
 0x102   : > { %v457_v8 = vmax.f32 %v427_v6, 0.0  ;;  %v683_v9 = vpop.f32.mrb[14].mxu0 }
 0x103   : > { %v442_v10 = vadd.f32 %v683_v9, %v595_v24  ;;  %v436_v11 = vpop.f32.mrb[15].mxu0 }
 0x104   : > { %v746_v12 = vpack.c.bf16 %v458_v7, %v457_v8  ;;  %v437_v13 = vadd.f32 %v595_v24, %v436_v11 }
 0x105   : > { %v460_v14 = vmax.f32 %v442_v10, 0.0 }
 0x106   : > { %738 = vmatpush3.bf16.xpose.msra.mxu1 %v737_v55  ;;  %v459_v15 = vmax.f32 %v437_v13, 0.0 }
 0x107   : > { %739 = vmatprep.subr.bf16.mxu1 %v774_v22 }
 0x108   : > { %v749_v16 = vpack.c.bf16 %v460_v14, %v459_v15 }
 0x10e   : > { %741 = vmatpush3.bf16.xpose.msra.mxu1 %v740_v62 }
 0x10f   : > { %742 = vmatprep.subr.bf16.mxu1 %v774_v22 }
 0x116   : > { %744 = vmatpush3.bf16.xpose.msra.mxu1 %v743_v5 }
 0x117   : > { %745 = vmatprep.subr.bf16.mxu1 %v774_v22 }
 0x11e   : > { %747 = vmatpush3.bf16.xpose.msra.mxu1 %v746_v12 }
 0x11f   : > { %748 = vmatprep.subr.bf16.mxu1 %v774_v22 }
 0x126   : > { %750 = vmatpush3.bf16.xpose.msra.mxu1 %v749_v16 }
 0x12d   : > { %717 = vmatmul.mubr.f32.vlgmr.msra.gmra.mrb[0].mxu1 %v461_v17 }
 0x200   : > { %v530_v19 = vpop.f32.mrb[0].mxu1 }
 0x201   : > { %v531_v20 = vadd.f32 %v530_v19, %v463_v18  ;;  %v718_v21 = vpop.f32.mrb[1].mxu1 }
 0x203   : > { %v612_v23 = vmul.f32 -1.442695, %v531_v20 }
 0x205   : > { %762 = vpow2.f32 %v612_v23 }
 0x20f   : > { %v763_v24 = vpop.eup %762 }
 0x210   : > { %v537_v25 = vadd.f32 1.0, %v763_v24 }
 0x212   : > { %764 = vrcp.f32 %v537_v25 }
 0x21c   : > { %v765_v22 = vpop.eup %764 }
 0x21d   : > { %540 = vst [vmem:[%s223_s16] sm:$0x1] %v765_v22 }
 0x21e PF: > { %s16_s20 = sadd.s32 1, %s772_s20  }
 0x21f   : > { %p13_p5 = scmp.ge.s32.totalorder %s16_s20, 5  }
 0x221   :  { %15 = sbr.rel (!%p13_p5) target bundleno = 2 (0x2), region = 70 }

</bundles_post_ra>
